<compile_context>
chip_gen: v5e
topology: v5e:2x2
jax: 0.10.0
libtpu: 0.0.40
codegen_flags: <defaults>
</compile_context>

<pallas_src>
import functools

import jax
import jax.numpy as jnp
from jax.experimental import pallas as pl
from jax.experimental.pallas import tpu as pltpu

# --- problem sizes (hopper-medium-v2) -------------------------------------
STATE_DIM = 11        # env.observation_space.shape[0]
ACTION_DIM = 3        # env.action_space.shape[0]
MAX_ACTION = 1.0      # float(env.action_space.high[0])
H1, H2 = 400, 300
H1_PAD, H2_PAD = 512, 384   # hidden widths padded to multiples of 128 (lane-dense)
OUT_PAD = 128               # output padded to one full 128-lane vreg (lane-dense stores)

_ALIGN = 16                 # batch-tile alignment (covers bf16 (16,128) sublane packing)
_SPLIT_THRESHOLD = 2048     # single-tile batches >= this get split into 2 grid steps


def _round_up(n, m):
    return ((n + m - 1) // m) * m


def _bf16_vpu_available():
    """bf16 VALU/EUP exist on v6e/v7x; keep the f32 epilogue on v5e and older."""
    try:
        kind = jax.devices()[0].device_kind.lower()
    except Exception:
        return False
    return ("v6" in kind) or ("v7" in kind)


def _actor_kernel(x_ref, w1_ref, b1_ref, w2_ref, b2_ref, w3_ref, b3_ref, o_ref,
                  *, bf16_epilogue):
    """One batch-tile of the MLP. Weights bf16, MXU accumulation f32.

    Epilogue (bias add + ReLU) dtype is bf16 on v6e/v7x, f32 on v5e.
    """
    ep = jnp.bfloat16 if bf16_epilogue else jnp.float32
    x = x_ref[...]                                            # (tb, 11) bf16

    # layer 1: bf16 MXU matmul (f32 acc) + bias/ReLU epilogue on the VPU
    h = jnp.dot(x, w1_ref[...], preferred_element_type=jnp.float32)
    h = jnp.maximum(h.astype(ep) + b1_ref[...].astype(ep), 0)

    # layer 2
    h = jnp.dot(h.astype(jnp.bfloat16), w2_ref[...],
                preferred_element_type=jnp.float32)
    h = jnp.maximum(h.astype(ep) + b2_ref[...].astype(ep), 0)

    # layer 3 (lane-dense 128-wide) + max_action * tanh in f32 (tanh -> EUP)
    h = jnp.dot(h.astype(jnp.bfloat16), w3_ref[...],
                preferred_element_type=jnp.float32) + b3_ref[...]
    o_ref[...] = (MAX_ACTION * jnp.tanh(h)).astype(o_ref.dtype)


def actor_forward(x, params, *, tile_b=2048, bf16_epilogue=None):
    """Batched forward: batch-tiled grid with VMEM-resident weights."""
    if bf16_epilogue is None:
        bf16_epilogue = _bf16_vpu_available()
    w1, b1, w2, b2, w3, b3 = params
    batch = x.shape[0]

    x = x.astype(jnp.bfloat16)           # halve x HBM->VMEM DMA (matmul is bf16 anyway)

    eff = _round_up(batch, _ALIGN)
    tb = min(_round_up(tile_b, _ALIGN), eff)
    if tb == eff and eff >= _SPLIT_THRESHOLD:
        # Large batch that would otherwise be one grid step: split in two so the
        # "parallel" batch axis can shard across both TensorCores on v7x.
        tb = _round_up(eff // 2, _ALIGN)
    padded = _round_up(batch, tb)
    if padded != batch:
        x = jnp.pad(x, ((0, padded - batch), (0, 0)))
    grid = (padded // tb,)

    def resident(shape):                 # full-array block, constant index_map -> stays in VMEM
        # TODO(synk): pipeline_mode=pl.Buffered(1) would skip double-buffering these
        # resident blocks; left off to stay conservative across jax versions.
        return pl.BlockSpec(shape, lambda i: (0, 0))

    weight_bytes = sum(int(p.size) * p.dtype.itemsize for p in params)
    flops = 2 * padded * (STATE_DIM * H1_PAD + H1_PAD * H2_PAD + H2_PAD * OUT_PAD)
    bytes_accessed = (padded * STATE_DIM * 2        # x (bf16)
                      + weight_bytes                # weights/biases
                      + padded * OUT_PAD * 4)       # output (f32, lane-dense)

    # VMEM budget for this tile: double-buffered x/out, resident weights (counted 2x
    # to be conservative), worst-case f32 intermediates.  Floor at 16 MiB (every
    # generation's smallest scoped default), cap at 48 MiB (< v7x's 64 MiB physical).
    per_step_bytes = (2 * tb * STATE_DIM * 2
                      + 2 * tb * OUT_PAD * 4
                      + 2 * weight_bytes
                      + tb * (H1_PAD + H2_PAD + OUT_PAD) * 4)
    vmem_limit = min(max(int(per_step_bytes * 1.5) + (4 << 20), 16 << 20), 48 << 20)

    out = pl.pallas_call(
        functools.partial(_actor_kernel, bf16_epilogue=bf16_epilogue),
        out_shape=jax.ShapeDtypeStruct((padded, OUT_PAD), jnp.float32),
        grid=grid,
        in_specs=[
            pl.BlockSpec((tb, STATE_DIM), lambda i: (i, 0)),   # x: tiled over batch
            resident(w1.shape), resident(b1.shape),
            resident(w2.shape), resident(b2.shape),
            resident(w3.shape), resident(b3.shape),
        ],
        out_specs=pl.BlockSpec((tb, OUT_PAD), lambda i: (i, 0)),
        compiler_params=pltpu.CompilerParams(
            dimension_semantics=("parallel",),       # shard batch grid across TCs (v7x)
            vmem_limit_bytes=vmem_limit,
        ),
        cost_estimate=pl.CostEstimate(
            flops=flops,
            transcendentals=padded * OUT_PAD,
            bytes_accessed=bytes_accessed,
        ),
    )(x, w1, b1, w2, b2, w3, b3)
    return out[:batch, :ACTION_DIM]


def init_params(key):
    """PyTorch-style U[-1/sqrt(fan_in), +] init, zero-padded to lane-dense shapes.

    Weights are stored pre-transposed as (in, out) and cast to bf16; biases stay f32.
    Zero padding rows/cols are mathematically inert through ReLU/tanh and the matmuls.
    """
    def linear(key, fan_in, fan_out, pad_in, pad_out):
        kw, kb = jax.random.split(key)
        bound = 1.0 / jnp.sqrt(fan_in)
        w = jax.random.uniform(kw, (fan_in, fan_out), jnp.float32, -bound, bound)
        b = jax.random.uniform(kb, (1, fan_out), jnp.float32, -bound, bound)
        w_pad = jnp.zeros((pad_in, pad_out), jnp.float32).at[:fan_in, :fan_out].set(w)
        b_pad = jnp.zeros((1, pad_out), jnp.float32).at[:, :fan_out].set(b)
        return w_pad.astype(jnp.bfloat16), b_pad      # bf16 weights, f32 biases

    k1, k2, k3 = jax.random.split(key, 3)
    w1, b1 = linear(k1, STATE_DIM, H1, STATE_DIM, H1_PAD)
    w2, b2 = linear(k2, H1, H2, H1_PAD, H2_PAD)
    w3, b3 = linear(k3, H2, ACTION_DIM, H2_PAD, OUT_PAD)
    return w1, b1, w2, b2, w3, b3


def actor_ref(x, params, *, bf16_epilogue=None):
    """Pure-JAX reference replicating the kernel's exact bf16/f32 math path."""
    if bf16_epilogue is None:
        bf16_epilogue = _bf16_vpu_available()
    ep = jnp.bfloat16 if bf16_epilogue else jnp.float32
    w1, b1, w2, b2, w3, b3 = params
    x = x.astype(jnp.bfloat16)
    h = jnp.dot(x, w1, preferred_element_type=jnp.float32)
    h = jnp.maximum(h.astype(ep) + b1.astype(ep), 0)
    h = jnp.dot(h.astype(jnp.bfloat16), w2, preferred_element_type=jnp.float32)
    h = jnp.maximum(h.astype(ep) + b2.astype(ep), 0)
    h = jnp.dot(h.astype(jnp.bfloat16), w3, preferred_element_type=jnp.float32) + b3
    return (MAX_ACTION * jnp.tanh(h))[:, :ACTION_DIM]


if __name__ == "__main__":
    key = jax.random.PRNGKey(0)
    kp, kx1, kx2, kx3 = jax.random.split(key, 4)
    params = init_params(kp)

    # small batch: single grid step, tile = (padded) batch
    x_small = jax.random.normal(kx1, (8, STATE_DIM), jnp.float32)
    out_small = jax.block_until_ready(actor_forward(x_small, params))
    ref_small = actor_ref(x_small, params)
    assert out_small.shape == (8, ACTION_DIM)
    assert jnp.allclose(out_small, ref_small, atol=5e-3, rtol=5e-3)

    # non-multiple batch with a multi-step batch grid (exercises padding + pipelining)
    x_mid = jax.random.normal(kx2, (200, STATE_DIM), jnp.float32)
    out_mid = jax.block_until_ready(actor_forward(x_mid, params, tile_b=64))
    ref_mid = actor_ref(x_mid, params)
    assert out_mid.shape == (200, ACTION_DIM)
    assert jnp.allclose(out_mid, ref_mid, atol=5e-3, rtol=5e-3)

    # batch at the split threshold: default tile path, >=2 grid steps (megacore on v7x)
    x_big = jax.random.normal(kx3, (2048, STATE_DIM), jnp.float32)
    out_big = jax.block_until_ready(actor_forward(x_big, params))
    ref_big = actor_ref(x_big, params)
    assert out_big.shape == (2048, ACTION_DIM)
    assert jnp.allclose(out_big, ref_big, atol=5e-3, rtol=5e-3)

    print("KERNEL_OK")
</pallas_src>

<mosaic_0001>
module attributes {stable_mosaic.version = 11 : i64} {
  func.func @_actor_kernel(%arg0: i32, %arg1: memref<16x11xbf16, #tpu.memory_space<vmem>>, %arg2: memref<11x512xbf16, #tpu.memory_space<vmem>>, %arg3: memref<1x512xf32, #tpu.memory_space<vmem>>, %arg4: memref<512x384xbf16, #tpu.memory_space<vmem>>, %arg5: memref<1x384xf32, #tpu.memory_space<vmem>>, %arg6: memref<384x128xbf16, #tpu.memory_space<vmem>>, %arg7: memref<1x128xf32, #tpu.memory_space<vmem>>, %arg8: memref<16x128xf32, #tpu.memory_space<vmem>>) attributes {dimension_semantics = [#tpu.dimension_semantics<parallel>], iteration_bounds = array<i64: 1>, scalar_prefetch = 0 : i64, scratch_operands = 0 : i64, tpu.core_type = #tpu.core_type<tc>, window_params = [{transform_indices = @transform_0, window_bounds = array<i64: 16, 11>}, {pipeline_mode = #tpu.pipeline_mode<synchronous>, transform_indices = @transform_1, window_bounds = array<i64: 11, 512>}, {pipeline_mode = #tpu.pipeline_mode<synchronous>, transform_indices = @transform_2, window_bounds = array<i64: 1, 512>}, {pipeline_mode = #tpu.pipeline_mode<synchronous>, transform_indices = @transform_3, window_bounds = array<i64: 512, 384>}, {pipeline_mode = #tpu.pipeline_mode<synchronous>, transform_indices = @transform_4, window_bounds = array<i64: 1, 384>}, {pipeline_mode = #tpu.pipeline_mode<synchronous>, transform_indices = @transform_5, window_bounds = array<i64: 384, 128>}, {pipeline_mode = #tpu.pipeline_mode<synchronous>, transform_indices = @transform_6, window_bounds = array<i64: 1, 128>}, {transform_indices = @transform_7, window_bounds = array<i64: 16, 128>}]} {
    %c0 = arith.constant 0 : index
    %c0_0 = arith.constant 0 : index
    %0 = vector.load %arg1[%c0, %c0_0] : memref<16x11xbf16, #tpu.memory_space<vmem>>, vector<16x11xbf16>
    %c0_1 = arith.constant 0 : index
    %c0_2 = arith.constant 0 : index
    %1 = vector.load %arg2[%c0_1, %c0_2] : memref<11x512xbf16, #tpu.memory_space<vmem>>, vector<11x512xbf16>
    %cst = arith.constant dense<0.000000e+00> : vector<16x512xf32>
    %2 = tpu.matmul %0, %1, %cst {dimension_numbers = #tpu.dot_dimension_numbers<[1], [0], [0], [1], [0, 0, 1, 1], [], []>} : vector<16x11xbf16>, vector<11x512xbf16>, vector<16x512xf32> -> vector<16x512xf32>
    %c0_3 = arith.constant 0 : index
    %c0_4 = arith.constant 0 : index
    %3 = vector.load %arg3[%c0_3, %c0_4] : memref<1x512xf32, #tpu.memory_space<vmem>>, vector<1x512xf32>
    %4 = vector.broadcast %3 : vector<1x512xf32> to vector<16x512xf32>
    %5 = arith.addf %2, %4 : vector<16x512xf32>
    %cst_5 = arith.constant 0.000000e+00 : f32
    %6 = vector.broadcast %cst_5 : f32 to vector<16x512xf32>
    %7 = arith.maximumf %5, %6 : vector<16x512xf32>
    %8 = arith.truncf %7 : vector<16x512xf32> to vector<16x512xbf16>
    %c0_6 = arith.constant 0 : index
    %c0_7 = arith.constant 0 : index
    %9 = vector.load %arg4[%c0_6, %c0_7] : memref<512x384xbf16, #tpu.memory_space<vmem>>, vector<512x384xbf16>
    %cst_8 = arith.constant dense<0.000000e+00> : vector<16x384xf32>
    %10 = tpu.matmul %8, %9, %cst_8 {dimension_numbers = #tpu.dot_dimension_numbers<[1], [0], [0], [1], [0, 0, 1, 1], [], []>} : vector<16x512xbf16>, vector<512x384xbf16>, vector<16x384xf32> -> vector<16x384xf32>
    %c0_9 = arith.constant 0 : index
    %c0_10 = arith.constant 0 : index
    %11 = vector.load %arg5[%c0_9, %c0_10] : memref<1x384xf32, #tpu.memory_space<vmem>>, vector<1x384xf32>
    %12 = vector.broadcast %11 : vector<1x384xf32> to vector<16x384xf32>
    %13 = arith.addf %10, %12 : vector<16x384xf32>
    %cst_11 = arith.constant 0.000000e+00 : f32
    %14 = vector.broadcast %cst_11 : f32 to vector<16x384xf32>
    %15 = arith.maximumf %13, %14 : vector<16x384xf32>
    %16 = arith.truncf %15 : vector<16x384xf32> to vector<16x384xbf16>
    %c0_12 = arith.constant 0 : index
    %c0_13 = arith.constant 0 : index
    %17 = vector.load %arg6[%c0_12, %c0_13] : memref<384x128xbf16, #tpu.memory_space<vmem>>, vector<384x128xbf16>
    %cst_14 = arith.constant dense<0.000000e+00> : vector<16x128xf32>
    %18 = tpu.matmul %16, %17, %cst_14 {dimension_numbers = #tpu.dot_dimension_numbers<[1], [0], [0], [1], [0, 0, 1, 1], [], []>} : vector<16x384xbf16>, vector<384x128xbf16>, vector<16x128xf32> -> vector<16x128xf32>
    %c0_15 = arith.constant 0 : index
    %c0_16 = arith.constant 0 : index
    %19 = vector.load %arg7[%c0_15, %c0_16] : memref<1x128xf32, #tpu.memory_space<vmem>>, vector<1x128xf32>
    %20 = vector.broadcast %19 : vector<1x128xf32> to vector<16x128xf32>
    %21 = arith.addf %18, %20 : vector<16x128xf32>
    %22 = math.tanh %21 : vector<16x128xf32>
    %cst_17 = arith.constant 1.000000e+00 : f32
    %23 = vector.broadcast %cst_17 : f32 to vector<16x128xf32>
    %24 = arith.mulf %23, %22 : vector<16x128xf32>
    %c0_18 = arith.constant 0 : index
    %c0_19 = arith.constant 0 : index
    %25 = vector.load %arg8[%c0_18, %c0_19] : memref<16x128xf32, #tpu.memory_space<vmem>>, vector<16x128xf32>
    tpu.vector_store %arg8[%c0_18, %c0_19], %24 {strides = array<i32>} : memref<16x128xf32, #tpu.memory_space<vmem>>, vector<16x128xf32>,
    return
  }
  func.func @transform_0(%arg0: i32) -> (i32, i32) {
    %c0_i32 = arith.constant 0 : i32
    %c0_i32_0 = arith.constant 0 : i32
    return %arg0, %c0_i32 : i32, i32
  }
  func.func @transform_1(%arg0: i32) -> (i32, i32) {
    %c0_i32 = arith.constant 0 : i32
    %c0_i32_0 = arith.constant 0 : i32
    %c0_i32_1 = arith.constant 0 : i32
    return %c0_i32, %c0_i32_0 : i32, i32
  }
  func.func @transform_2(%arg0: i32) -> (i32, i32) {
    %c0_i32 = arith.constant 0 : i32
    %c0_i32_0 = arith.constant 0 : i32
    %c0_i32_1 = arith.constant 0 : i32
    return %c0_i32, %c0_i32_0 : i32, i32
  }
  func.func @transform_3(%arg0: i32) -> (i32, i32) {
    %c0_i32 = arith.constant 0 : i32
    %c0_i32_0 = arith.constant 0 : i32
    %c0_i32_1 = arith.constant 0 : i32
    return %c0_i32, %c0_i32_0 : i32, i32
  }
  func.func @transform_4(%arg0: i32) -> (i32, i32) {
    %c0_i32 = arith.constant 0 : i32
    %c0_i32_0 = arith.constant 0 : i32
    %c0_i32_1 = arith.constant 0 : i32
    return %c0_i32, %c0_i32_0 : i32, i32
  }
  func.func @transform_5(%arg0: i32) -> (i32, i32) {
    %c0_i32 = arith.constant 0 : i32
    %c0_i32_0 = arith.constant 0 : i32
    %c0_i32_1 = arith.constant 0 : i32
    return %c0_i32, %c0_i32_0 : i32, i32
  }
  func.func @transform_6(%arg0: i32) -> (i32, i32) {
    %c0_i32 = arith.constant 0 : i32
    %c0_i32_0 = arith.constant 0 : i32
    %c0_i32_1 = arith.constant 0 : i32
    return %c0_i32, %c0_i32_0 : i32, i32
  }
  func.func @transform_7(%arg0: i32) -> (i32, i32) {
    %c0_i32 = arith.constant 0 : i32
    %c0_i32_0 = arith.constant 0 : i32
    return %arg0, %c0_i32 : i32, i32
  }
}

</mosaic_0001>

<bundles_post_ra>
// kernel: tpu_custom_call.1
= control target key start
LH: loop header
LB: loop body
LE: loop exit
PB: predicated region body
PF: predicated region fallthrough
CT: control target
= control target key end

     0   :  { %12 = vsyncpa [#allocation3], 0  ;;  %s2238_s0 = inlined_call_operand.hbm [shape: bf16[16,11], index: 0, kind: input, shape index: {}]   ;;  %s2239_s1 = inlined_call_operand.hbm [shape: bf16[11,512], index: 1, kind: input, shape index: {}]   ;;  %s2240_s2 = inlined_call_operand.hbm [shape: f32[1,512], index: 2, kind: input, shape index: {}]   ;;  %s2241_s3 = inlined_call_operand.hbm [shape: bf16[512,384], index: 3, kind: input, shape index: {}]   ;;  %s2242_s4 = inlined_call_operand.vmem [shape: f32[1,384], index: 4, kind: input, shape index: {}]   ;;  %s2243_s5 = inlined_call_operand.hbm [shape: bf16[384,128], index: 5, kind: input, shape index: {}]   ;;  %s2244_s6 = inlined_call_operand.vmem [shape: f32[1,128], index: 6, kind: input, shape index: {}]   ;;  %s2245_s7 = inlined_call_operand.hbm [shape: f32[16,128], index: 7, kind: output, shape index: {}]  }
   0x1   :  { %13 = vsyncpa [#allocation6], 0 }
   0x2   :  { %14 = vsyncpa [#allocation9], 0  ;;  %s33_s26 = sshll.u32 %s2239_s1, 4  ;;  %s34_s26 = int_to_ptr.hbm [resolvable:$true] %s33_s26 }
   0x3   :  { %15 = vsyncpa [#allocation4], 0  ;;  %s2118_s27 = smov [#allocation5]   ;;  %s57_s8 = sshll.u32 %s2241_s3, 4  ;;  %s58_s8 = int_to_ptr.hbm [resolvable:$true] %s57_s8 }
   0x4   :  { %s35_s28 = sshll.u32 %s2118_s27, 4  ;;  %s2119_s9 = smov 256   ;;  %s36_s28 = int_to_ptr.vmem [resolvable:$true] %s35_s28 }
   0x5   :  { %s2120_s10 = smov 16   ;;  %s2121_s11 = smov [#allocation8]  }
   0x6   :  { %41 = dma.hbm_to_vmem [thread:$0]  %s34_s26, 512, %s36_s28, [#allocation6], %s2119_s9, %s2119_s9, %s2120_s10  }
   0x7   :  { %s59_s12 = sshll.u32 %s2121_s11, 4  ;;  %s2122_s13 = smov 192   ;;  %s60_s12 = int_to_ptr.vmem [resolvable:$true] %s59_s12 }
   0x8   :  { %s2123_s14 = smov 12   ;;  %s20_s16 = sshll.u32 %s2238_s0, 4  ;;  %s21_s16 = int_to_ptr.hbm [resolvable:$true] %s20_s16 }
   0x9   :  { %65 = dma.hbm_to_vmem [thread:$0]  %s58_s8, 12288, %s60_s12, [#allocation9], %s2122_s13, %s2122_s13, %s2123_s14  }
   0xa   :  { %s2124_s17 = smov [#allocation2]   ;;  %s47_s20 = sshll.u32 %s2240_s2, 4  ;;  %s48_s20 = int_to_ptr.hbm [resolvable:$true] %s47_s20 }
   0xb   :  { %s22_s18 = sshll.u32 %s2124_s17, 4  ;;  %s2125_s21 = smov 64   ;;  %s23_s18 = int_to_ptr.vmem [resolvable:$true] %s22_s18 }
   0xc   :  { %s2126_s22 = smov 4   ;;  %s2127_s23 = smov [#allocation7]  }
   0xd   :  { %28 = dma.hbm_to_vmem [thread:$0]  %s21_s16, 128, %s23_s18, [#allocation3], %s2125_s21, %s2125_s21, %s2126_s22  }
   0xe   :  { %s49_s24 = sshll.u32 %s2127_s23, 4  ;;  %s72_s27 = sshll.u32 %s2243_s5, 4  ;;  %s50_s24 = int_to_ptr.vmem [resolvable:$true] %s49_s24  ;;  %s73_s27 = int_to_ptr.hbm [resolvable:$true] %s72_s27 }
   0xf   :  { %52 = dma.hbm_to_vmem [thread:$0]  %s48_s20, 64, %s50_s24, [#allocation6]  }
  0x10   :  { %s2128_s0 = smov [#allocation10]  }
  0x11   :  { %s74_s28 = sshll.u32 %s2128_s0, 4  ;;  %s75_s28 = int_to_ptr.vmem [resolvable:$true] %s74_s28 }
  0x12   :  { %80 = dma.hbm_to_vmem [thread:$0]  %s73_s27, 3072, %s75_s28, [#allocation9], %s2125_s21, %s2125_s21, %s2126_s22  }
  0x13   :  { %2110 = dma.done.wait [#allocation3], 128  }
  0x14   :  { %2111 = vsyncadd [#allocation3], 4294967168 }
  0x15   :  { %2112 = dma.done.wait [#allocation6], 576  }
  0x16   :  { %2113 = vsyncadd [#allocation6], 4294966720 }
  0x17   :  { %2114 = dma.done.wait [#allocation9], 15360  }
  0x18   :  { %2115 = vsyncadd [#allocation9], 4294951936  ;;  %vm145_vm0 = vcmask 1044480   ;;  %vm146_vm1 = vcmask 1045504   ;;  %v2129_v0 = vmov 65535   ;;  %v2188_v12 = vld [vmem:[#allocation2] sm:$0xff] }
  0x19   :  { %v147_v1 = vsel %vm145_vm0, 4294967295, %v2129_v0  ;;  %v1323_v3 = vld [vmem:[#allocation5] sm:$0xf]  ;;  %v1824_v4 = vld [vmem:[#allocation5 + $0xc] sm:$0x30]  ;;  %vm141_vm2 = vcmask 89088  }
  0x1a   :  { %v148_v2 = vsel %vm146_vm1, %v147_v1, 0  ;;  %v1822_v5 = vld [vmem:[#allocation5 + $0x4] sm:$0xf]  ;;  %v1324_v6 = vor.u32 %v1824_v4, %v1323_v3  ;;  %v1325_v7 = vld [vmem:[#allocation5 + $0x10] sm:$0x30]  ;;  %s2130_s30 = smov [#allocation11]  }
  0x1b   :  { %v1331_v8 = vld [vmem:[#allocation5 + $0x8] sm:$0xf]  ;;  %v1825_v9 = vld [vmem:[#allocation5 + $0x14] sm:$0x30]  ;;  %v1328_v10 = vor.u32 %v1822_v5, %v1325_v7  ;;  %v1823_v13 = vld [vmem:[#allocation5 + $0xc] sm:$0xf] }
  0x1c   :  { %v1332_v11 = vor.u32 %v1825_v9, %v1331_v8  ;;  %v1333_v14 = vld [vmem:[#allocation5 + $0x18] sm:$0x30]  ;;  %v150_v15 = vand.u32 %v1324_v6, %v148_v2  ;;  %v1523_v17 = vld [vmem:[#allocation8 + $0x168] sm:$0xf]  ;;  %v1872_v18 = vld [vmem:[#allocation8 + $0x170] sm:$0xf0] }
  0x1d   :  { %v1336_v16 = vor.u32 %v1823_v13, %v1333_v14  ;;  %v1511_v19 = vld [vmem:[#allocation8 + $0x150] sm:$0xf]  ;;  %v153_v20 = vand.u32 %v1328_v10, %v148_v2  ;;  %v1524_v22 = vor.u32 %v1872_v18, %v1523_v17  ;;  %v1869_v23 = vld [vmem:[#allocation8 + $0x158] sm:$0xf0]  ;;  %v1427_v24 = vld [vmem:[#allocation8 + $0xa8] sm:$0xf] }
  0x1e   :  { %v156_v21 = vand.u32 %v1332_v11, %v148_v2  ;;  %v1848_v25 = vld [vmem:[#allocation8 + $0xb0] sm:$0xf0]  ;;  %168 = vmatpush.bf16.msra.mxu3 %v150_v15  ;;  %v1619_v28 = vld [vmem:[#allocation8 + $0x228] sm:$0xf]  ;;  %v1415_v31 = vld [vmem:[#allocation8 + $0x90] sm:$0xf]  ;;  %v1512_v33 = vor.u32 %v1869_v23, %v1511_v19 }
  0x1f   :  { %v159_v26 = vand.u32 %v1336_v16, %v148_v2  ;;  %v1428_v27 = vor.u32 %v1848_v25, %v1427_v24  ;;  %v1896_v29 = vld [vmem:[#allocation8 + $0x230] sm:$0xf0]  ;;  %182 = vmatpush.bf16.msra.mxu1 %v153_v20  ;;  %v1845_v32 = vld [vmem:[#allocation8 + $0x98] sm:$0xf0]  ;;  %v1607_v34 = vld [vmem:[#allocation8 + $0x210] sm:$0xf] }
  0x20   :  { %196 = vmatpush.bf16.msra.mxu2 %v156_v21  ;;  %v1620_v30 = vor.u32 %v1896_v29, %v1619_v28  ;;  %v1893_v35 = vld [vmem:[#allocation8 + $0x218] sm:$0xf0]  ;;  %v1499_v36 = vld [vmem:[#allocation8 + $0x138] sm:$0xf]  ;;  %v1866_v37 = vld [vmem:[#allocation8 + $0x140] sm:$0xf0]  ;;  %v1416_v38 = vor.u32 %v1845_v32, %v1415_v31 }
  0x21   :  { %1337 = vmatmul.msk.bf16.vlgmr.msra.gmra.mxu3 %vm141_vm2, %v2188_v12  ;;  %877 = vmatpush.bf16.msra.mxu0 %v1428_v27  ;;  %v1403_v39 = vld [vmem:[#allocation8 + $0x78] sm:$0xf]  ;;  %v1842_v40 = vld [vmem:[#allocation8 + $0x80] sm:$0xf0]  ;;  %v1608_v41 = vor.u32 %v1893_v35, %v1607_v34  ;;  %v1500_v42 = vor.u32 %v1866_v37, %v1499_v36  ;;  %v1487_v45 = vld [vmem:[#allocation8 + $0x120] sm:$0xf] }
  0x22   :  { %210 = vmatpush.bf16.msrb.mxu3 %v159_v26  ;;  %1338 = vmatmul.msk.bf16.vlgmr.msra.gmra.mxu1 %vm141_vm2, %v2188_v12  ;;  %v1595_v43 = vld [vmem:[#allocation8 + $0x1f8] sm:$0xf]  ;;  %v1890_v44 = vld [vmem:[#allocation8 + $0x200] sm:$0xf0]  ;;  %v1863_v46 = vld [vmem:[#allocation8 + $0x128] sm:$0xf0]  ;;  %v1404_v47 = vor.u32 %v1842_v40, %v1403_v39 }
  0x23   :  { %891 = vmatpush.bf16.msrb.mxu1 %v1524_v22  ;;  %1339 = vmatmul.msk.bf16.vlgmr.msra.gmra.mxu2 %vm141_vm2, %v2188_v12  ;;  %v1391_v48 = vld [vmem:[#allocation8 + $0x60] sm:$0xf]  ;;  %v1839_v49 = vld [vmem:[#allocation8 + $0x68] sm:$0xf0]  ;;  %v1715_v50 = vld [vmem:[#allocation8 + $0x2e8] sm:$0xf]  ;;  %v1596_v51 = vor.u32 %v1890_v44, %v1595_v43  ;;  %v1488_v53 = vor.u32 %v1863_v46, %v1487_v45 }
  0x24   :  { %905 = vmatpush.bf16.msrb.mxu2 %v1620_v30  ;;  %v1920_v52 = vld [vmem:[#allocation8 + $0x2f0] sm:$0xf0]  ;;  %v1475_v54 = vld [vmem:[#allocation8 + $0x108] sm:$0xf]  ;;  %v1583_v55 = vld [vmem:[#allocation8 + $0x1e0] sm:$0xf]  ;;  %v1392_v59 = vor.u32 %v1839_v49, %v1391_v48 }
  0x25   :  { %878 = vmatpush.bf16.msra.mxu0 %v1416_v38  ;;  %v1887_v56 = vld [vmem:[#allocation8 + $0x1e8] sm:$0xf0]  ;;  %v1716_v57 = vor.u32 %v1920_v52, %v1715_v50  ;;  %v1860_v58 = vld [vmem:[#allocation8 + $0x110] sm:$0xf0]  ;;  %v1703_v60 = vld [vmem:[#allocation8 + $0x2d0] sm:$0xf] }
  0x26   :  { %v1917_v61 = vld [vmem:[#allocation8 + $0x2d8] sm:$0xf0]  ;;  %v1379_v62 = vld [vmem:[#allocation8 + $0x48] sm:$0xf]  ;;  %v1836_v63 = vld [vmem:[#allocation8 + $0x50] sm:$0xf0]  ;;  %v1584_v1 = vor.u32 %v1887_v56, %v1583_v55  ;;  %v1476_v2 = vor.u32 %v1860_v58, %v1475_v54 }
  0x27   :  { %892 = vmatpush.bf16.msrb.mxu1 %v1512_v33  ;;  %919 = vmatpush.bf16.msra.mxu3 %v1716_v57  ;;  %v1704_v0 = vor.u32 %v1917_v61, %v1703_v60  ;;  %v1571_v3 = vld [vmem:[#allocation8 + $0x1c8] sm:$0xf]  ;;  %v1884_v4 = vld [vmem:[#allocation8 + $0x1d0] sm:$0xf0]  ;;  %v1691_v5 = vld [vmem:[#allocation8 + $0x2b8] sm:$0xf]  ;;  %v1380_v8 = vor.u32 %v1836_v63, %v1379_v62 }
  0x28   :  { %906 = vmatpush.bf16.msrb.mxu2 %v1608_v41  ;;  %v1463_v6 = vld [vmem:[#allocation8 + $0xf0] sm:$0xf]  ;;  %v1857_v7 = vld [vmem:[#allocation8 + $0xf8] sm:$0xf0]  ;;  %v1914_v9 = vld [vmem:[#allocation8 + $0x2c0] sm:$0xf0]  ;;  %v1572_v14 = vor.u32 %v1884_v4, %v1571_v3 }
  0x29   :  { %879 = vmatpush.bf16.msra.mxu0 %v1404_v47  ;;  %v1367_v10 = vld [vmem:[#allocation8 + $0x30] sm:$0xf]  ;;  %v1833_v11 = vld [vmem:[#allocation8 + $0x38] sm:$0xf0]  ;;  %v1692_v13 = vor.u32 %v1914_v9, %v1691_v5  ;;  %v1679_v15 = vld [vmem:[#allocation8 + $0x2a0] sm:$0xf]  ;;  %v1464_v17 = vor.u32 %v1857_v7, %v1463_v6 }
  0x2a   :  { %v1911_v16 = vld [vmem:[#allocation8 + $0x2a8] sm:$0xf0]  ;;  %v1559_v18 = vld [vmem:[#allocation8 + $0x1b0] sm:$0xf]  ;;  %v1881_v19 = vld [vmem:[#allocation8 + $0x1b8] sm:$0xf0]  ;;  %v1368_v22 = vor.u32 %v1833_v11, %v1367_v10 }
  0x2b   :  { %893 = vmatpush.bf16.msrb.mxu1 %v1500_v42  ;;  %920 = vmatpush.bf16.msra.mxu3 %v1704_v0  ;;  %v1451_v20 = vld [vmem:[#allocation8 + $0xd8] sm:$0xf]  ;;  %v1854_v21 = vld [vmem:[#allocation8 + $0xe0] sm:$0xf0]  ;;  %v1680_v25 = vor.u32 %v1911_v16, %v1679_v15  ;;  %v1560_v26 = vor.u32 %v1881_v19, %v1559_v18  ;;  %v1667_v27 = vld [vmem:[#allocation8 + $0x288] sm:$0xf] }
  0x2c   :  { %907 = vmatpush.bf16.msrb.mxu2 %v1596_v51  ;;  %v1355_v23 = vld [vmem:[#allocation8 + $0x18] sm:$0xf]  ;;  %v1830_v24 = vld [vmem:[#allocation8 + $0x20] sm:$0xf0]  ;;  %v1908_v28 = vld [vmem:[#allocation8 + $0x290] sm:$0xf0]  ;;  %v1452_v29 = vor.u32 %v1854_v21, %v1451_v20 }
  0x2d   :  { %880 = vmatpush.bf16.msra.mxu0 %v1392_v59  ;;  %v1439_v30 = vld [vmem:[#allocation8 + $0xc0] sm:$0xf]  ;;  %v1547_v31 = vld [vmem:[#allocation8 + $0x198] sm:$0xf]  ;;  %v1878_v32 = vld [vmem:[#allocation8 + $0x1a0] sm:$0xf0]  ;;  %v1356_v34 = vor.u32 %v1830_v24, %v1355_v23  ;;  %v1668_v38 = vor.u32 %v1908_v28, %v1667_v27 }
  0x2e   :  { %v1851_v33 = vld [vmem:[#allocation8 + $0xc8] sm:$0xf0]  ;;  %v1525_v35 = vld [vmem:[#allocation8 + $0x174] sm:$0xf0]  ;;  %v1343_v36 = vld [vmem:[#allocation8] sm:$0xf]  ;;  %v1548_v39 = vor.u32 %v1878_v32, %v1547_v31 }
  0x2f   :  { %894 = vmatpush.bf16.msrb.mxu1 %v1488_v53  ;;  %921 = vmatpush.bf16.msra.mxu3 %v1692_v13  ;;  %v1827_v37 = vld [vmem:[#allocation8 + $0x8] sm:$0xf0]  ;;  %v1429_v41 = vld [vmem:[#allocation8 + $0xb4] sm:$0xf0]  ;;  %v1440_v42 = vor.u32 %v1851_v33, %v1439_v30  ;;  %v1535_v43 = vld [vmem:[#allocation8 + $0x180] sm:$0xf] }
  0x30   :  { %908 = vmatpush.bf16.msrb.mxu2 %v1584_v1  ;;  %v1847_v40 = vld [vmem:[#allocation8 + $0xac] sm:$0xf]  ;;  %v1344_v46 = vor.u32 %v1827_v37, %v1343_v36  ;;  %v1621_v48 = vld [vmem:[#allocation8 + $0x234] sm:$0xf0]  ;;  %v1868_v49 = vld [vmem:[#allocation8 + $0x154] sm:$0xf] }
  0x31   :  { %1340 = vmatmul.msk.bf16.vlgmr.msrb.gmra.mxu3 %vm141_vm2, %v2188_v12  ;;  %881 = vmatpush.bf16.msra.mxu0 %v1380_v8  ;;  %v1871_v12 = vld [vmem:[#allocation8 + $0x16c] sm:$0xf]  ;;  %v1513_v50 = vld [vmem:[#allocation8 + $0x15c] sm:$0xf0]  ;;  %v1432_v51 = vor.u32 %v1847_v40, %v1429_v41  ;;  %v1844_v53 = vld [vmem:[#allocation8 + $0x94] sm:$0xf] }
  0x32   :  { %v1875_v44 = vld [vmem:[#allocation8 + $0x188] sm:$0xf0]  ;;  %v1528_v45 = vor.u32 %v1871_v12, %v1525_v35  ;;  %v1417_v54 = vld [vmem:[#allocation8 + $0x9c] sm:$0xf0]  ;;  %v1516_v56 = vor.u32 %v1868_v49, %v1513_v50  ;;  %v1892_v57 = vld [vmem:[#allocation8 + $0x214] sm:$0xf] }
  0x33   :  { %895 = vmatpush.bf16.msrb.mxu1 %v1476_v2  ;;  %922 = vmatpush.bf16.msra.mxu3 %v1680_v25  ;;  %v1895_v47 = vld [vmem:[#allocation8 + $0x22c] sm:$0xf]  ;;  %v1536_v52 = vor.u32 %v1875_v44, %v1535_v43  ;;  %v1609_v58 = vld [vmem:[#allocation8 + $0x21c] sm:$0xf0]  ;;  %v1865_v59 = vld [vmem:[#allocation8 + $0x13c] sm:$0xf]  ;;  %v1420_v61 = vor.u32 %v1844_v53, %v1417_v54 }
  0x34   :  { %909 = vmatpush.bf16.msrb.mxu2 %v1572_v14  ;;  %v1624_v55 = vor.u32 %v1895_v47, %v1621_v48  ;;  %v1501_v60 = vld [vmem:[#allocation8 + $0x144] sm:$0xf0]  ;;  %v1612_v62 = vor.u32 %v1892_v57, %v1609_v58  ;;  %v1862_v0 = vld [vmem:[#allocation8 + $0x124] sm:$0xf]  ;;  %v1489_v1 = vld [vmem:[#allocation8 + $0x12c] sm:$0xf0] }
  0x35   :  { %882 = vmatpush.bf16.msra.mxu0 %v1368_v22  ;;  %v1504_v63 = vor.u32 %v1865_v59, %v1501_v60  ;;  %v1492_v2 = vor.u32 %v1862_v0, %v1489_v1  ;;  %v1655_v3 = vld [vmem:[#allocation8 + $0x270] sm:$0xf]  ;;  %v1905_v4 = vld [vmem:[#allocation8 + $0x278] sm:$0xf0]  ;;  %v1405_v7 = vld [vmem:[#allocation8 + $0x84] sm:$0xf0] }
  0x36   :  { %v1656_v5 = vor.u32 %v1905_v4, %v1655_v3  ;;  %v1841_v6 = vld [vmem:[#allocation8 + $0x7c] sm:$0xf]  ;;  %v1597_v10 = vld [vmem:[#allocation8 + $0x204] sm:$0xf0]  ;;  %v1859_v13 = vld [vmem:[#allocation8 + $0x10c] sm:$0xf] }
  0x37   :  { %896 = vmatpush.bf16.msrb.mxu1 %v1464_v17  ;;  %923 = vmatpush.bf16.msra.mxu3 %v1668_v38  ;;  %v1889_v8 = vld [vmem:[#allocation8 + $0x1fc] sm:$0xf]  ;;  %v1408_v9 = vor.u32 %v1841_v6, %v1405_v7  ;;  %v1477_v14 = vld [vmem:[#allocation8 + $0x114] sm:$0xf0]  ;;  %v1902_v17 = vld [vmem:[#allocation8 + $0x260] sm:$0xf0] }
  0x38   :  { %910 = vmatpush.bf16.msrb.mxu2 %v1560_v26  ;;  %v1600_v11 = vor.u32 %v1889_v8, %v1597_v10  ;;  %v1480_v15 = vor.u32 %v1859_v13, %v1477_v14  ;;  %v1643_v16 = vld [vmem:[#allocation8 + $0x258] sm:$0xf]  ;;  %v1838_v19 = vld [vmem:[#allocation8 + $0x64] sm:$0xf]  ;;  %v1393_v20 = vld [vmem:[#allocation8 + $0x6c] sm:$0xf0] }
  0x39   :  { %883 = vmatpush.bf16.msra.mxu0 %v1356_v34  ;;  %v1644_v18 = vor.u32 %v1902_v17, %v1643_v16  ;;  %v1886_v21 = vld [vmem:[#allocation8 + $0x1e4] sm:$0xf]  ;;  %v1396_v22 = vor.u32 %v1838_v19, %v1393_v20  ;;  %v1585_v23 = vld [vmem:[#allocation8 + $0x1ec] sm:$0xf0]  ;;  %v1856_v25 = vld [vmem:[#allocation8 + $0xf4] sm:$0xf] }
  0x3a   :  { %v1588_v24 = vor.u32 %v1886_v21, %v1585_v23  ;;  %v1465_v26 = vld [vmem:[#allocation8 + $0xfc] sm:$0xf0]  ;;  %v1835_v31 = vld [vmem:[#allocation8 + $0x4c] sm:$0xf]  ;;  %v1381_v32 = vld [vmem:[#allocation8 + $0x54] sm:$0xf0] }
  0x3b   :  { %897 = vmatpush.bf16.msrb.mxu1 %v1452_v29  ;;  %924 = vmatpush.bf16.msra.mxu3 %v1656_v5  ;;  %v1468_v27 = vor.u32 %v1856_v25, %v1465_v26  ;;  %v1631_v28 = vld [vmem:[#allocation8 + $0x240] sm:$0xf]  ;;  %v1899_v29 = vld [vmem:[#allocation8 + $0x248] sm:$0xf0]  ;;  %v1384_v12 = vor.u32 %v1835_v31, %v1381_v32  ;;  %v1573_v34 = vld [vmem:[#allocation8 + $0x1d4] sm:$0xf0] }
  0x3c   :  { %911 = vmatpush.bf16.msrb.mxu2 %v1548_v39  ;;  %v1632_v30 = vor.u32 %v1899_v29, %v1631_v28  ;;  %v1883_v33 = vld [vmem:[#allocation8 + $0x1cc] sm:$0xf]  ;;  %v1717_v36 = vld [vmem:[#allocation8 + $0x2f4] sm:$0xf0]  ;;  %v1853_v39 = vld [vmem:[#allocation8 + $0xdc] sm:$0xf] }
  0x3d   :  { %884 = vmatpush.bf16.msra.mxu0 %v1344_v46  ;;  %v1919_v35 = vld [vmem:[#allocation8 + $0x2ec] sm:$0xf]  ;;  %v1576_v37 = vor.u32 %v1883_v33, %v1573_v34  ;;  %v1453_v40 = vld [vmem:[#allocation8 + $0xe4] sm:$0xf0]  ;;  %v1369_v43 = vld [vmem:[#allocation8 + $0x3c] sm:$0xf0] }
  0x3e   :  { %v1720_v38 = vor.u32 %v1919_v35, %v1717_v36  ;;  %v1456_v41 = vor.u32 %v1853_v39, %v1453_v40  ;;  %v1880_v44 = vld [vmem:[#allocation8 + $0x1b4] sm:$0xf]  ;;  %v1561_v46 = vld [vmem:[#allocation8 + $0x1bc] sm:$0xf0]  ;;  %v1829_v54 = vld [vmem:[#allocation8 + $0x1c] sm:$0xf] }
  0x3f   :  { %898 = vmatpush.bf16.msrb.mxu1 %v1440_v42  ;;  %925 = vmatpush.bf16.msra.mxu3 %v1644_v18  ;;  %v1832_v42 = vld [vmem:[#allocation8 + $0x34] sm:$0xf]  ;;  %v1705_v48 = vld [vmem:[#allocation8 + $0x2dc] sm:$0xf0]  ;;  %v1564_v49 = vor.u32 %v1880_v44, %v1561_v46  ;;  %v1549_v58 = vld [vmem:[#allocation8 + $0x1a4] sm:$0xf0] }
  0x40   :  { %912 = vmatpush.bf16.msrb.mxu2 %v1536_v52  ;;  %v1916_v47 = vld [vmem:[#allocation8 + $0x2d4] sm:$0xf]  ;;  %v1441_v52 = vld [vmem:[#allocation8 + $0xcc] sm:$0xf0]  ;;  %v1913_v59 = vld [vmem:[#allocation8 + $0x2bc] sm:$0xf] }
  0x41   :  { %933 = vmatpush.bf16.msrb.mxu0 %v1432_v51  ;;  %v1708_v50 = vor.u32 %v1916_v47, %v1705_v48  ;;  %v1850_v51 = vld [vmem:[#allocation8 + $0xc4] sm:$0xf]  ;;  %v1693_v60 = vld [vmem:[#allocation8 + $0x2c4] sm:$0xf0]  ;;  %v1345_v0 = vld [vmem:[#allocation8 + $0xc] sm:$0xf0] }
  0x42   :  { %v1444_v53 = vor.u32 %v1850_v51, %v1441_v52  ;;  %v1874_v1 = vld [vmem:[#allocation8 + $0x184] sm:$0xf]  ;;  %v1537_v3 = vld [vmem:[#allocation8 + $0x18c] sm:$0xf0]  ;;  %v1907_v8 = vld [vmem:[#allocation8 + $0x28c] sm:$0xf] }
  0x43   :  { %947 = vmatpush.bf16.msra.mxu1 %v1528_v45  ;;  %926 = vmatpush.bf16.msra.mxu3 %v1632_v30  ;;  %v1372_v45 = vor.u32 %v1832_v42, %v1369_v43  ;;  %v1910_v4 = vld [vmem:[#allocation8 + $0x2a4] sm:$0xf]  ;;  %v1681_v5 = vld [vmem:[#allocation8 + $0x2ac] sm:$0xf0]  ;;  %v1540_v6 = vor.u32 %v1874_v1, %v1537_v3  ;;  %v1657_v13 = vld [vmem:[#allocation8 + $0x27c] sm:$0xf0] }
  0x44   :  { %961 = vmatpush.bf16.msra.mxu2 %v1624_v55  ;;  %v1357_v55 = vld [vmem:[#allocation8 + $0x24] sm:$0xf0]  ;;  %v1684_v7 = vor.u32 %v1910_v4, %v1681_v5  ;;  %v2198_v18 = vld [vmem:[#allocation7] sm:$0xf]  ;;  %v1898_v21 = vld [vmem:[#allocation8 + $0x244] sm:$0xf] }
  0x45   :  { %934 = vmatpush.bf16.msrb.mxu0 %v1420_v61  ;;  %v1360_v57 = vor.u32 %v1829_v54, %v1357_v55  ;;  %v1645_v16 = vld [vmem:[#allocation8 + $0x264] sm:$0xf0]  ;;  %v113_v20 = vperm.slane %v2198_v18, 1  ;;  %v112_v28 = vperm.slane %v2198_v18, 0  ;;  %v1531_v32 = vld [vmem:[#allocation8 + $0x170] sm:$0xf] }
  0x46   :  { %v1873_v33 = vld [vmem:[#allocation8 + $0x178] sm:$0xf0]  ;;  %v1519_v39 = vld [vmem:[#allocation8 + $0x158] sm:$0xf]  ;;  %v1870_v40 = vld [vmem:[#allocation8 + $0x160] sm:$0xf0] }
  0x47   :  { %948 = vmatpush.bf16.msra.mxu1 %v1516_v56  ;;  %975 = vmatpush.bf16.msrb.mxu3 %v1720_v38  ;;  %v1877_v56 = vld [vmem:[#allocation8 + $0x19c] sm:$0xf]  ;;  %v1532_v36 = vor.u32 %v1873_v33, %v1531_v32  ;;  %v1435_v43 = vld [vmem:[#allocation8 + $0xb0] sm:$0xf]  ;;  %v1520_v51 = vor.u32 %v1870_v40, %v1519_v39  ;;  %v1507_v54 = vld [vmem:[#allocation8 + $0x140] sm:$0xf] }
  0x48   :  { %962 = vmatpush.bf16.msra.mxu2 %v1612_v62  ;;  %v1552_v61 = vor.u32 %v1877_v56, %v1549_v58  ;;  %v1696_v62 = vor.u32 %v1913_v59, %v1693_v60  ;;  %v1849_v44 = vld [vmem:[#allocation8 + $0xb8] sm:$0xf0]  ;;  %v1627_v47 = vld [vmem:[#allocation8 + $0x230] sm:$0xf]  ;;  %v1867_v55 = vld [vmem:[#allocation8 + $0x148] sm:$0xf0] }
  0x49   :  { %935 = vmatpush.bf16.msrb.mxu0 %v1408_v9  ;;  %v1669_v9 = vld [vmem:[#allocation8 + $0x294] sm:$0xf0]  ;;  %v1897_v48 = vld [vmem:[#allocation8 + $0x238] sm:$0xf0]  ;;  %v1846_v59 = vld [vmem:[#allocation8 + $0xa0] sm:$0xf0] }
  0x4a   :  { %v1672_v10 = vor.u32 %v1907_v8, %v1669_v9  ;;  %v1423_v58 = vld [vmem:[#allocation8 + $0x98] sm:$0xf]  ;;  %v1864_v3 = vld [vmem:[#allocation8 + $0x130] sm:$0xf0]  ;;  %v1411_v5 = vld [vmem:[#allocation8 + $0x80] sm:$0xf] }
  0x4b   :  { %949 = vmatpush.bf16.msra.mxu1 %v1504_v63  ;;  %976 = vmatpush.bf16.msrb.mxu3 %v1708_v50  ;;  %v1826_v63 = vld [vmem:[#allocation8 + $0x4] sm:$0xf]  ;;  %v1424_v1 = vor.u32 %v1846_v59, %v1423_v58  ;;  %v1891_v8 = vld [vmem:[#allocation8 + $0x208] sm:$0xf0]  ;;  %v115_v9 = vperm.slane %v2198_v18, 3  ;;  %s1300_s8 = sshll.u32 %s2130_s30, 4  ;;  %s1301_s8 = int_to_ptr.vmem [resolvable:$true] %s1300_s8 }
  0x4c   :  { %963 = vmatpush.bf16.msra.mxu2 %v1600_v11  ;;  %v1904_v11 = vld [vmem:[#allocation8 + $0x274] sm:$0xf]  ;;  %v1555_v58 = vld [vmem:[#allocation8 + $0x1a0] sm:$0xf]  ;;  %v1879_v59 = vld [vmem:[#allocation8 + $0x1a8] sm:$0xf0] }
  0x4d   :  { %936 = vmatpush.bf16.msrb.mxu0 %v1396_v22  ;;  %v1660_v14 = vor.u32 %v1904_v11, %v1657_v13  ;;  %v1633_v22 = vld [vmem:[#allocation8 + $0x24c] sm:$0xf0]  ;;  %s2131_s11 = smov 128   ;;  %s2132_s12 = smov 8  }
  0x4e   :  { %v1636_v23 = vor.u32 %v1898_v21, %v1633_v22  ;;  %v1483_v13 = vld [vmem:[#allocation8 + $0x110] sm:$0xf] }
  0x4f   :  { %950 = vmatpush.bf16.msra.mxu1 %v1492_v2  ;;  %977 = vmatpush.bf16.msrb.mxu3 %v1696_v62  ;;  %v1348_v2 = vor.u32 %v1826_v63, %v1345_v0  ;;  %v1894_v62 = vld [vmem:[#allocation8 + $0x220] sm:$0xf0]  ;;  %v1508_v63 = vor.u32 %v1867_v55, %v1507_v54  ;;  %v1363_v54 = vld [vmem:[#allocation8 + $0x20] sm:$0xf] }
  0x50   :  { %964 = vmatpush.bf16.msra.mxu2 %v1588_v24 }
  0x51   :  { %937 = vmatpush.bf16.msrb.mxu0 %v1384_v12 }
  0x53   :  { %951 = vmatpush.bf16.msra.mxu1 %v1480_v15  ;;  %978 = vmatpush.bf16.msrb.mxu3 %v1684_v7  ;;  %v1901_v15 = vld [vmem:[#allocation8 + $0x25c] sm:$0xf]  ;;  %v1603_v7 = vld [vmem:[#allocation8 + $0x200] sm:$0xf] }
  0x54   :  { %965 = vmatpush.bf16.msra.mxu2 %v1576_v37  ;;  %v1648_v17 = vor.u32 %v1901_v15, %v1645_v16  ;;  %v1604_v15 = vor.u32 %v1891_v8, %v1603_v7  ;;  %v1399_v16 = vld [vmem:[#allocation8 + $0x68] sm:$0xf]  ;;  %v1912_v8 = vld [vmem:[#allocation8 + $0x2b0] sm:$0xf0] }
  0x55   :  { %938 = vmatpush.bf16.msrb.mxu0 %v1372_v45  ;;  %v1687_v7 = vld [vmem:[#allocation8 + $0x2a8] sm:$0xf] }
  0x57   :  { %952 = vmatpush.bf16.msra.mxu1 %v1468_v27  ;;  %979 = vmatpush.bf16.msrb.mxu3 %v1672_v10  ;;  %v114_v27 = vperm.slane %v2198_v18, 2  ;;  %v1858_v18 = vld [vmem:[#allocation8 + $0x100] sm:$0xf0] }
  0x58   :  { %966 = vmatpush.bf16.msra.mxu2 %v1564_v49 }
  0x59   :  { %939 = vmatpush.bf16.msrb.mxu0 %v1360_v57  ;;  %v1628_v57 = vor.u32 %v1897_v48, %v1627_v47  ;;  %v1711_v48 = vld [vmem:[#allocation8 + $0x2d8] sm:$0xf] }
  0x5b   :  { %953 = vmatpush.bf16.msra.mxu1 %v1456_v41  ;;  %980 = vmatpush.bf16.msrb.mxu3 %v1660_v14  ;;  %v1861_v14 = vld [vmem:[#allocation8 + $0x118] sm:$0xf0] }
  0x5c   :  { %967 = vmatpush.bf16.msra.mxu2 %v1552_v61  ;;  %v1615_v61 = vld [vmem:[#allocation8 + $0x218] sm:$0xf]  ;;  %v1484_v22 = vor.u32 %v1861_v14, %v1483_v13  ;;  %v1675_v13 = vld [vmem:[#allocation8 + $0x290] sm:$0xf]  ;;  %v1909_v14 = vld [vmem:[#allocation8 + $0x298] sm:$0xf0] }
  0x5d   :  { %940 = vmatpush.bf16.msrb.mxu0 %v1348_v2  ;;  %v1495_v2 = vld [vmem:[#allocation8 + $0x128] sm:$0xf]  ;;  %v1616_v4 = vor.u32 %v1894_v62, %v1615_v61  ;;  %v1699_v62 = vld [vmem:[#allocation8 + $0x2c0] sm:$0xf] }
  0x5e   :  { %v1496_v10 = vor.u32 %v1864_v3, %v1495_v2  ;;  %v1351_v2 = vld [vmem:[#allocation8 + $0x8] sm:$0xf] }
  0x5f   :  { %954 = vmatpush.bf16.msra.mxu1 %v1444_v53  ;;  %981 = vmatpush.bf16.msrb.mxu3 %v1648_v17  ;;  %v1436_v53 = vor.u32 %v1849_v44, %v1435_v43  ;;  %v1840_v17 = vld [vmem:[#allocation8 + $0x70] sm:$0xf0]  ;;  %v1834_v44 = vld [vmem:[#allocation8 + $0x40] sm:$0xf0] }
  0x60   :  { %968 = vmatpush.bf16.msra.mxu2 %v1540_v6  ;;  %v1843_v6 = vld [vmem:[#allocation8 + $0x88] sm:$0xf0] }
  0x61   :  { %v1412_v11 = vor.u32 %v1843_v6, %v1411_v5  ;;  %v1543_v5 = vld [vmem:[#allocation8 + $0x188] sm:$0xf]  ;;  %v1876_v6 = vld [vmem:[#allocation8 + $0x190] sm:$0xf0] }
  0x63   :  { %982 = vmatpush.bf16.msrb.mxu3 %v1636_v23 }
  0x9f   :  { %v184_v19 = vpop.f32.mrf.mxu1 }
  0xa0   :  { %v185_v24 = vadd.f32 %v184_v19, %v113_v20  ;;  %v1591_v19 = vld [vmem:[#allocation8 + $0x1e8] sm:$0xf] }
  0xa2   :  { %v218_v30 = vmax.f32 %v185_v24, 0.0  ;;  %v1400_v24 = vor.u32 %v1840_v17, %v1399_v16  ;;  %v1663_v16 = vld [vmem:[#allocation8 + $0x278] sm:$0xf]  ;;  %v1906_v17 = vld [vmem:[#allocation8 + $0x280] sm:$0xf0] }
  0xa4   :  { %v170_v25 = vpop.f32.mrf.mxu3 }
  0xa5   :  { %v171_v35 = vadd.f32 %v170_v25, %v112_v28  ;;  %v1471_v25 = vld [vmem:[#allocation8 + $0xf8] sm:$0xf] }
  0xa6   :  { %v198_v26 = vpop.f32.mrf.mxu2 }
  0xa7   :  { %v186_v29 = vpop.f32.mrf.mxu1  ;;  %v199_v12 = vadd.f32 %v198_v26, %v114_v27  ;;  %v217_v49 = vmax.f32 %v171_v35, 0.0  ;;  %v1921_v35 = vld [vmem:[#allocation8 + $0x2f8] sm:$0xf0] }
  0xa8   :  { %v187_v31 = vadd.f32 %v186_v29, %v113_v20  ;;  %v1888_v20 = vld [vmem:[#allocation8 + $0x1f0] sm:$0xf0]  ;;  %v1837_v29 = vld [vmem:[#allocation8 + $0x58] sm:$0xf0] }
  0xa9   :  { %v219_v45 = vmax.f32 %v199_v12, 0.0  ;;  %v1472_v12 = vor.u32 %v1858_v18, %v1471_v25  ;;  %v1929_v25 = vld [vmem:[#allocation10 + $0x38] sm:$0xff]  ;;  %v1928_v18 = vld [vmem:[#allocation10 + $0x30] sm:$0xff] }
  0xaa   :  { %v222_v34 = vmax.f32 %v187_v31, 0.0  ;;  %v1885_v31 = vld [vmem:[#allocation8 + $0x1d8] sm:$0xf0] }
  0xac   :  { %v2203_v37 = vpack.c.bf16 %v222_v34, %v218_v30  ;;  %v172_v38 = vpop.f32.mrf.mxu3  ;;  %v1579_v30 = vld [vmem:[#allocation8 + $0x1d0] sm:$0xf] }
  0xad   :  { %v173_v41 = vadd.f32 %v172_v38, %v112_v28  ;;  %v1387_v28 = vld [vmem:[#allocation8 + $0x50] sm:$0xf]  ;;  %v1855_v38 = vld [vmem:[#allocation8 + $0xe8] sm:$0xf0] }
  0xae   :  { %v200_v42 = vpop.f32.mrf.mxu2  ;;  %899 = vmatmul.bf16.vlgmr.msrb.gmra.mxu1 %v2203_v37  ;;  %v1723_v34 = vld [vmem:[#allocation8 + $0x2f0] sm:$0xf]  ;;  %v1388_v40 = vor.u32 %v1837_v29, %v1387_v28 }
  0xaf   :  { %v201_v46 = vadd.f32 %v200_v42, %v114_v27  ;;  %v221_v50 = vmax.f32 %v173_v41, 0.0  ;;  %1003 = vmatpush.bf16.msrb.mxu1 %v1532_v36  ;;  %v1592_v27 = vor.u32 %v1888_v20, %v1591_v19  ;;  %v1459_v36 = vld [vmem:[#allocation8 + $0xe0] sm:$0xf]  ;;  %v1580_v41 = vor.u32 %v1885_v31, %v1579_v30  ;;  %v1375_v42 = vld [vmem:[#allocation8 + $0x38] sm:$0xf]  ;;  %v1924_v28 = vld [vmem:[#allocation10 + $0x10] sm:$0xff] }
  0xb0   :  { %v1724_v43 = vor.u32 %v1921_v35, %v1723_v34  ;;  %v1460_v47 = vor.u32 %v1855_v38, %v1459_v36  ;;  %v1664_v19 = vor.u32 %v1906_v17, %v1663_v16  ;;  %v1651_v20 = vld [vmem:[#allocation8 + $0x260] sm:$0xf]  ;;  %v1936_v29 = vld [vmem:[#allocation10 + $0x70] sm:$0xff]  ;;  %v1923_v30 = vld [vmem:[#allocation10 + $0x8] sm:$0xff] }
  0xb1   :  { %v223_v52 = vmax.f32 %v201_v46, 0.0  ;;  %v2206_v56 = vpack.c.bf16 %v221_v50, %v217_v49  ;;  %v1882_v46 = vld [vmem:[#allocation8 + $0x1c0] sm:$0xf0]  ;;  %v1447_v50 = vld [vmem:[#allocation8 + $0xc8] sm:$0xf]  ;;  %v1933_v34 = vld [vmem:[#allocation10 + $0x58] sm:$0xff] }
  0xb2   :  { %v1918_v49 = vld [vmem:[#allocation8 + $0x2e0] sm:$0xf0]  ;;  %v1935_v31 = vld [vmem:[#allocation10 + $0x68] sm:$0xff]  ;;  %v1945_v35 = vld [vmem:[#allocation10 + $0xb8] sm:$0xff] }
  0xb3   :  { %v2208_v60 = vpack.c.bf16 %v223_v52, %v219_v45  ;;  %1004 = vmatpush.bf16.msrb.mxu1 %v1520_v51  ;;  %885 = vmatmul.bf16.vlgmr.msra.gmra.mxu0 %v2206_v56  ;;  %v1567_v45 = vld [vmem:[#allocation8 + $0x1b8] sm:$0xf]  ;;  %v1852_v51 = vld [vmem:[#allocation8 + $0xd0] sm:$0xf0]  ;;  %v1376_v52 = vor.u32 %v1834_v44, %v1375_v42  ;;  %v1712_v55 = vor.u32 %v1918_v49, %v1711_v48  ;;  %v1943_v44 = vld [vmem:[#allocation10 + $0xa8] sm:$0xff] }
  0xb4   :  { %v212_v0 = vpop.f32.mrf.mxu3  ;;  %989 = vmatpush.bf16.msra.mxu0 %v1436_v53  ;;  %v1568_v53 = vor.u32 %v1882_v46, %v1567_v45  ;;  %v1448_v61 = vor.u32 %v1852_v51, %v1447_v50  ;;  %v1930_v46 = vld [vmem:[#allocation10 + $0x40] sm:$0xff] }
  0xb5   :  { %913 = vmatmul.bf16.vlgmr.msrb.gmra.mxu2 %v2208_v60  ;;  %v213_v21 = vadd.f32 %v212_v0, %v115_v9 }
  0xb6   :  { %1017 = vmatpush.bf16.msrb.mxu2 %v1628_v57  ;;  %v1831_v57 = vld [vmem:[#allocation8 + $0x28] sm:$0xf0] }
  0xb7   :  { %1005 = vmatpush.bf16.msrb.mxu1 %v1508_v63  ;;  %v220_v32 = vmax.f32 %v213_v21, 0.0  ;;  %v1915_v63 = vld [vmem:[#allocation8 + $0x2c8] sm:$0xf0]  ;;  %v1364_v0 = vor.u32 %v1831_v57, %v1363_v54  ;;  %v1940_v57 = vld [vmem:[#allocation10 + $0x90] sm:$0xff] }
  0xb8   :  { %990 = vmatpush.bf16.msra.mxu0 %v1424_v1  ;;  %v1556_v1 = vor.u32 %v1879_v59, %v1555_v58  ;;  %v1700_v3 = vor.u32 %v1915_v63, %v1699_v62  ;;  %v1903_v21 = vld [vmem:[#allocation8 + $0x268] sm:$0xf0] }
  0xba   :  { %1018 = vmatpush.bf16.msrb.mxu2 %v1616_v4  ;;  %v1828_v4 = vld [vmem:[#allocation8 + $0x10] sm:$0xf0] }
  0xbb   :  { %1006 = vmatpush.bf16.msrb.mxu1 %v1496_v10  ;;  %v1544_v10 = vor.u32 %v1876_v6, %v1543_v5 }
  0xbc   :  { %v214_v23 = vpop.f32.mrf.mxu3  ;;  %991 = vmatpush.bf16.msra.mxu0 %v1412_v11  ;;  %v1688_v11 = vor.u32 %v1912_v8, %v1687_v7  ;;  %v1938_v8 = vld [vmem:[#allocation10 + $0x80] sm:$0xff] }
  0xbd   :  { %v215_v26 = vadd.f32 %v214_v23, %v115_v9  ;;  %v1352_v9 = vor.u32 %v1828_v4, %v1351_v2  ;;  %v1900_v23 = vld [vmem:[#allocation8 + $0x250] sm:$0xf0]  ;;  %v1939_v2 = vld [vmem:[#allocation10 + $0x88] sm:$0xff] }
  0xbe   :  { %1019 = vmatpush.bf16.msrb.mxu2 %v1604_v15  ;;  %955 = vmatmul.bf16.vlgmr.msra.gmra.mxu1 %v2203_v37  ;;  %v1676_v15 = vor.u32 %v1909_v14, %v1675_v13 }
  0xbf   :  { %v224_v33 = vmax.f32 %v215_v26, 0.0  ;;  %1007 = vmatpush.bf16.msrb.mxu1 %v1484_v22  ;;  %v1639_v22 = vld [vmem:[#allocation8 + $0x248] sm:$0xf]  ;;  %v1925_v26 = vld [vmem:[#allocation10 + $0x18] sm:$0xff] }
  0xc0   :  { %992 = vmatpush.bf16.msra.mxu0 %v1400_v24  ;;  %v1640_v24 = vor.u32 %v1900_v23, %v1639_v22 }
  0xc1   :  { %v2214_v39 = vpack.c.bf16 %v224_v33, %v220_v32  ;;  %v1922_v32 = vld [vmem:[#allocation10] sm:$0xff] }
  0xc2   :  { %1020 = vmatpush.bf16.msrb.mxu2 %v1592_v27  ;;  %v1937_v27 = vld [vmem:[#allocation10 + $0x78] sm:$0xff]  ;;  %v1934_v33 = vld [vmem:[#allocation10 + $0x60] sm:$0xff] }
  0xc3   :  { %1008 = vmatpush.bf16.msrb.mxu1 %v1472_v12  ;;  %927 = vmatmul.bf16.vlgmr.msra.gmra.mxu3 %v2214_v39 }
  0xc4   :  { %941 = vmatmul.bf16.vlgmr.msrb.gmra.mxu0 %v2206_v56  ;;  %1031 = vmatpush.bf16.msra.mxu3 %v1724_v43  ;;  %v1931_v43 = vld [vmem:[#allocation10 + $0x48] sm:$0xff] }
  0xc5   :  { %969 = vmatmul.bf16.vlgmr.msra.gmra.mxu2 %v2208_v60  ;;  %993 = vmatpush.bf16.msra.mxu0 %v1388_v40  ;;  %v1944_v40 = vld [vmem:[#allocation10 + $0xb0] sm:$0xff] }
  0xc6   :  { %1021 = vmatpush.bf16.msrb.mxu2 %v1580_v41  ;;  %v2227_v41 = vld [vmem:[%s2242_s4] sm:$0x7] }
  0xc7   :  { %1009 = vmatpush.bf16.msrb.mxu1 %v1460_v47  ;;  %v359_v45 = vperm.slane %v2227_v41, 0  ;;  %v1942_v47 = vld [vmem:[#allocation10 + $0xa0] sm:$0xff]  ;;  %v360_v4 = vperm.slane %v2227_v41, 1 }
  0xc8   :  { %1032 = vmatpush.bf16.msra.mxu3 %v1712_v55 }
  0xc9   :  { %994 = vmatpush.bf16.msra.mxu0 %v1376_v52  ;;  %v1941_v52 = vld [vmem:[#allocation10 + $0x98] sm:$0xff] }
  0xca   :  { %1022 = vmatpush.bf16.msrb.mxu2 %v1568_v53 }
  0xcb   :  { %1010 = vmatpush.bf16.msrb.mxu1 %v1448_v61 }
  0xcc   :  { %1033 = vmatpush.bf16.msra.mxu3 %v1700_v3 }
  0xcd   :  { %995 = vmatpush.bf16.msra.mxu0 %v1364_v0 }
  0xce   :  { %1023 = vmatpush.bf16.msrb.mxu2 %v1556_v1  ;;  %1011 = vmatmul.bf16.vlgmr.msrb.gmra.mxu1 %v2203_v37  ;;  %v1652_v37 = vor.u32 %v1903_v21, %v1651_v20 }
  0xcf   :  { %1264 = vmatpush.bf16.msra.mxu1 %v1937_v27 }
  0xd0   :  { %1034 = vmatpush.bf16.msra.mxu3 %v1688_v11 }
  0xd1   :  { %996 = vmatpush.bf16.msra.mxu0 %v1352_v9 }
  0xd2   :  { %1024 = vmatpush.bf16.msrb.mxu2 %v1544_v10 }
  0xd3   :  { %983 = vmatmul.bf16.vlgmr.msrb.gmra.mxu3 %v2214_v39  ;;  %1265 = vmatpush.bf16.msra.mxu1 %v1936_v29 }
  0xd4   :  { %997 = vmatmul.bf16.vlgmr.msra.gmra.mxu0 %v2206_v56  ;;  %1035 = vmatpush.bf16.msra.mxu3 %v1676_v15  ;;  %v1927_v56 = vld [vmem:[#allocation10 + $0x28] sm:$0xff] }
  0xd5   :  { %1025 = vmatmul.bf16.vlgmr.msrb.gmra.mxu2 %v2208_v60  ;;  %1250 = vmatpush.bf16.msrb.mxu0 %v1929_v25  ;;  %v1926_v60 = vld [vmem:[#allocation10 + $0x20] sm:$0xff] }
  0xd6   :  { %1278 = vmatpush.bf16.msra.mxu2 %v1945_v35 }
  0xd7   :  { %1266 = vmatpush.bf16.msra.mxu1 %v1935_v31 }
  0xd8   :  { %1036 = vmatpush.bf16.msra.mxu3 %v1664_v19 }
  0xd9   :  { %1251 = vmatpush.bf16.msrb.mxu0 %v1928_v18 }
  0xda   :  { %1279 = vmatpush.bf16.msra.mxu2 %v1944_v40 }
  0xdb   :  { %1267 = vmatpush.bf16.msra.mxu1 %v1934_v33 }
  0xdc   :  { %1037 = vmatpush.bf16.msra.mxu3 %v1652_v37 }
  0xdd   :  { %1252 = vmatpush.bf16.msrb.mxu0 %v1927_v56 }
  0xde   :  { %1280 = vmatpush.bf16.msra.mxu2 %v1943_v44  ;;  %v1961_v44 = vld [vmem:[%s2244_s6] ss:$0 sm:$0xff]  ;;  %s1302_s6 = sshll.u32 %s2245_s7, 4  ;;  %s1303_s6 = int_to_ptr.hbm [resolvable:$true] %s1302_s6 }
  0xdf   :  { %1268 = vmatpush.bf16.msra.mxu1 %v1933_v34 }
  0xe0   :  { %1038 = vmatpush.bf16.msra.mxu3 %v1640_v24 }
  0xe1   :  { %1253 = vmatpush.bf16.msrb.mxu0 %v1926_v60  ;;  %v361_v60 = vperm.slane %v2227_v41, 2 }
  0xe2   :  { %1281 = vmatpush.bf16.msra.mxu2 %v1942_v47 }
  0xe3   :  { %1039 = vmatmul.bf16.vlgmr.msra.gmra.mxu3 %v2214_v39  ;;  %v1932_v39 = vld [vmem:[#allocation10 + $0x50] sm:$0xff] }
  0xe4   :  { %1269 = vmatpush.bf16.msra.mxu1 %v1932_v39 }
  0xe5   :  { %1254 = vmatpush.bf16.msrb.mxu0 %v1925_v26 }
  0xe6   :  { %1282 = vmatpush.bf16.msra.mxu2 %v1941_v52 }
  0xe8   :  { %1270 = vmatpush.bf16.msra.mxu1 %v1931_v43 }
  0xe9   :  { %1255 = vmatpush.bf16.msrb.mxu0 %v1924_v28 }
  0xea   :  { %1283 = vmatpush.bf16.msra.mxu2 %v1940_v57 }
  0xec   :  { %1271 = vmatpush.bf16.msra.mxu1 %v1930_v46 }
  0xed   :  { %1256 = vmatpush.bf16.msrb.mxu0 %v1923_v30 }
  0xee   :  { %1284 = vmatpush.bf16.msra.mxu2 %v1939_v2 }
  0xf1   :  { %1257 = vmatpush.bf16.msrb.mxu0 %v1922_v32 }
  0xf2   :  { %1285 = vmatpush.bf16.msra.mxu2 %v1938_v8 }
 0x12b   :  { %v900_v36 = vpop.f32.mrf.mxu1 }
 0x130   :  { %v886_v12 = vpop.f32.mrf.mxu0 }
 0x131   :  { %v887_v50 = vadd.f32 %v886_v12, %v359_v45 }
 0x133   :  { %v902_v48 = vpop.f32.mrf.mxu1  ;;  %v901_v55 = vadd.f32 %v900_v36, %v887_v50 }
 0x138   :  { %v914_v38 = vpop.f32.mrf.mxu2  ;;  %v888_v42 = vpop.f32.mrf.mxu0 }
 0x139   :  { %v889_v53 = vadd.f32 %v888_v42, %v359_v45  ;;  %v915_v58 = vadd.f32 %v914_v38, %v901_v55 }
 0x13b   :  { %v903_v59 = vadd.f32 %v902_v48, %v889_v53  ;;  %v956_v61 = vpop.f32.mrf.mxu1 }
 0x140   :  { %v916_v49 = vpop.f32.mrf.mxu2 }
 0x141   :  { %v942_v54 = vpop.f32.mrf.mxu0  ;;  %v917_v62 = vadd.f32 %v916_v49, %v903_v59 }
 0x142   :  { %v943_v10 = vadd.f32 %v942_v54, %v360_v4 }
 0x143   :  { %v958_v14 = vpop.f32.mrf.mxu1 }
 0x144   :  { %v957_v16 = vadd.f32 %v956_v61, %v943_v10 }
 0x146   :  { %v928_v51 = vpop.f32.mrf.mxu3 }
 0x147   :  { %v929_v63 = vadd.f32 %v928_v51, %v915_v58 }
 0x148   :  { %v970_v0 = vpop.f32.mrf.mxu2 }
 0x149   :  { %v1045_v5 = vmax.f32 %v929_v63, 0.0  ;;  %v944_v7 = vpop.f32.mrf.mxu0  ;;  %v971_v17 = vadd.f32 %v970_v0, %v957_v16 }
 0x14a   :  { %v945_v13 = vadd.f32 %v944_v7, %v360_v4 }
 0x14b   :  { %v1012_v18 = vpop.f32.mrf.mxu1 }
 0x14c   :  { %v959_v19 = vadd.f32 %v958_v14, %v945_v13 }
 0x14e   :  { %v930_v1 = vpop.f32.mrf.mxu3 }
 0x14f   :  { %v931_v3 = vadd.f32 %v930_v1, %v917_v62 }
 0x150   :  { %v972_v15 = vpop.f32.mrf.mxu2 }
 0x151   :  { %v1048_v6 = vmax.f32 %v931_v3, 0.0  ;;  %v998_v20 = vpop.f32.mrf.mxu0  ;;  %v973_v21 = vadd.f32 %v972_v15, %v959_v19 }
 0x152   :  { %v999_v28 = vadd.f32 %v998_v20, %v361_v60 }
 0x153   :  { %v1051_v9 = vpack.c.bf16 %v1048_v6, %v1045_v5  ;;  %v1014_v32 = vpop.f32.mrf.mxu1 }
 0x154   :  { %v1013_v31 = vadd.f32 %v1012_v18, %v999_v28 }
 0x155   :  { %1258 = vmatmul.bf16.vlgmr.msrb.gmra.mxu0 %v1051_v9 }
 0x156   :  { %v984_v11 = vpop.f32.mrf.mxu3 }
 0x157   :  { %v985_v37 = vadd.f32 %v984_v11, %v971_v17 }
 0x158   :  { %v1026_v56 = vpop.f32.mrf.mxu2 }
 0x159   :  { %v1046_v24 = vmax.f32 %v985_v37, 0.0  ;;  %v1000_v27 = vpop.f32.mrf.mxu0  ;;  %v1027_v12 = vadd.f32 %v1026_v56, %v1013_v31 }
 0x15a   :  { %v1001_v30 = vadd.f32 %v1000_v27, %v361_v60 }
 0x15c   :  { %v1015_v34 = vadd.f32 %v1014_v32, %v1001_v30 }
 0x15e   :  { %v986_v22 = vpop.f32.mrf.mxu3 }
 0x15f   :  { %v987_v23 = vadd.f32 %v986_v22, %v973_v21 }
 0x160   :  { %v1028_v33 = vpop.f32.mrf.mxu2 }
 0x161   :  { %v1049_v25 = vmax.f32 %v987_v23, 0.0  ;;  %v1029_v35 = vadd.f32 %v1028_v33, %v1015_v34 }
 0x163   :  { %v1052_v26 = vpack.c.bf16 %v1049_v25, %v1046_v24 }
 0x165   :  { %1272 = vmatmul.bf16.vlgmr.msra.gmra.mxu1 %v1052_v26 }
 0x166   :  { %v1040_v29 = vpop.f32.mrf.mxu3 }
 0x167   :  { %v1041_v36 = vadd.f32 %v1040_v29, %v1027_v12 }
 0x169   :  { %v1047_v40 = vmax.f32 %v1041_v36, 0.0 }
 0x16e   :  { %v1042_v38 = vpop.f32.mrf.mxu3 }
 0x16f   :  { %v1043_v39 = vadd.f32 %v1042_v38, %v1029_v35 }
 0x171   :  { %v1050_v42 = vmax.f32 %v1043_v39, 0.0 }
 0x173   :  { %v1053_v43 = vpack.c.bf16 %v1050_v42, %v1047_v40 }
 0x175   :  { %1286 = vmatmul.bf16.vlgmr.msra.gmra.mxu2 %v1053_v43 }
 0x1d2   :  { %v1259_v41 = vpop.f32.mrf.mxu0 }
 0x1d3   :  { %v1260_v46 = vadd.f32 %v1961_v44, %v1259_v41 }
 0x1da   :  { %v1261_v50 = vpop.f32.mrf.mxu0 }
 0x1db   :  { %v1262_v52 = vadd.f32 %v1961_v44, %v1261_v50 }
 0x1e2   :  { %v1273_v45 = vpop.f32.mrf.mxu1 }
 0x1e3   :  { %v1274_v47 = vadd.f32 %v1273_v45, %v1260_v46 }
 0x1ea   :  { %v1275_v51 = vpop.f32.mrf.mxu1 }
 0x1eb   :  { %v1276_v53 = vadd.f32 %v1275_v51, %v1262_v52 }
 0x1f8   :  { %v1287_v48 = vpop.f32.mrf.mxu2 }
 0x1f9   :  { %v1288_v49 = vadd.f32 %v1287_v48, %v1274_v47 }
 0x1fb   :  { %1962 = vtanh.f32 %v1288_v49 }
 0x200   :  { %v1289_v54 = vpop.f32.mrf.mxu2 }
 0x201   :  { %v1963_v55 = vpop.eup %1962  ;;  %v1290_v57 = vadd.f32 %v1289_v54, %v1276_v53 }
 0x202   :  { %1294 = vst [vmem:[#allocation11] sm:$0xff] %v1963_v55 }
 0x203   :  { %1964 = vtanh.f32 %v1290_v57 }
 0x209   :  { %v1965_v58 = vpop.eup %1964 }
 0x20a   :  { %1295 = vst [vmem:[#allocation11 + $0x8] sm:$0xff] %v1965_v58 }
 0x20b   :  { %1308 = dma.vmem_to_hbm [thread:$0]  %s1301_s8, 256, %s1303_s6, [#allocation4], %s2131_s11, %s2131_s11, %s2132_s12  }
 0x20c   :  { %2116 = dma.done.wait [#allocation4], 256  }
 0x20d   :  { %2117 = vsyncadd [#allocation4], 4294967040 }
 0x20e   :  { %1313 = vsyncpa [#allocation3], 1 }
 0x20f   :  { %1314 = vsyncpa [#allocation6], 1 }
 0x210   :  { %1315 = vsyncpa [#allocation9], 1 }
 0x211   :  { %1316 = vsyncpa [#allocation4], 1 }

</bundles_post_ra>
